<compile_context>
chip_gen: v7x
topology: tpu7x:2x2x1
jax: 0.10.0
libtpu: 0.0.40
codegen_flags: <defaults>
</compile_context>

<pallas_src>
import jax
import jax.numpy as jnp
from jax.experimental import pallas as pl
from jax.experimental.pallas import tpu as pltpu


def _round_up(x, m):
    return (x + m - 1) // m * m


def qnetwork_kernel(x_ref, w1_ref, b1_ref, w2_ref, b2_ref, w3_ref, b3_ref,
                    out_ref):
    # fc1 + relu  (bf16 MXU inputs, f32 accumulate, f32 epilogue)
    h1 = jnp.dot(x_ref[...], w1_ref[...], preferred_element_type=jnp.float32)
    h1 = jnp.maximum(h1 + b1_ref[...], 0.0)
    # fc2 + relu
    h2 = jnp.dot(h1.astype(jnp.bfloat16), w2_ref[...],
                 preferred_element_type=jnp.float32)
    h2 = jnp.maximum(h2 + b2_ref[...], 0.0)
    # fc3 (no activation)
    y = jnp.dot(h2.astype(jnp.bfloat16), w3_ref[...],
                preferred_element_type=jnp.float32)
    out_ref[...] = (y + b3_ref[...]).astype(out_ref.dtype)


def qnetwork_forward(x, params, *, block_b=1024):
    """x: [..., input_dim] float32.  params: dict of w1,b1,w2,b2,w3,b3 (f32)."""
    w1, b1 = params["w1"], params["b1"]
    w2, b2 = params["w2"], params["b2"]
    w3, b3 = params["w3"], params["b3"]

    in_dim = w1.shape[0]
    out_dim = w3.shape[1]

    lead_shape = x.shape[:-1]
    x2 = x.reshape(-1, in_dim)
    B = x2.shape[0]

    # Batch tile: multiple of 8, as large as possible up to block_b.
    tb = min(block_b, max(8, _round_up(B, 8)))
    b_pad = _round_up(B, tb)
    if b_pad != B:
        x2 = jnp.pad(x2, ((0, b_pad - B), (0, 0)))

    # bf16 activations/weights: full-rate MXU + halved HBM->VMEM bytes.
    xb = x2.astype(jnp.bfloat16)
    w1b = w1.astype(jnp.bfloat16)
    w2b = w2.astype(jnp.bfloat16)
    w3b = w3.astype(jnp.bfloat16)

    # Weights/biases: single full block, constant index_map -> VMEM-resident.
    def resident(shape):
        return pl.BlockSpec(shape, lambda i: (0,) * len(shape))

    out = pl.pallas_call(
        qnetwork_kernel,
        out_shape=jax.ShapeDtypeStruct((b_pad, out_dim), jnp.float32),
        grid=(b_pad // tb,),
        in_specs=[
            pl.BlockSpec((tb, in_dim), lambda i: (i, 0)),   # x tile
            resident(w1b.shape), resident(b1.shape),
            resident(w2b.shape), resident(b2.shape),
            resident(w3b.shape), resident(b3.shape),
        ],
        out_specs=pl.BlockSpec((tb, out_dim), lambda i: (i, 0)),
        compiler_params=pltpu.CompilerParams(
            dimension_semantics=("parallel",)),
    )(xb, w1b, b1, w2b, b2, w3b, b3)

    return out[:B].reshape(*lead_shape, out_dim)


def init_params(key, input_dim, output_dim, hidden=128):
    """Deterministic init mirroring nn.Linear's uniform(-1/sqrt(fan_in), ...)."""
    ks = jax.random.split(key, 6)

    def linear(kw, kb, fan_in, fan_out):
        bound = 1.0 / jnp.sqrt(fan_in)
        w = jax.random.uniform(kw, (fan_in, fan_out), jnp.float32, -bound, bound)
        b = jax.random.uniform(kb, (1, fan_out), jnp.float32, -bound, bound)
        return w, b

    w1, b1 = linear(ks[0], ks[1], input_dim, hidden)
    w2, b2 = linear(ks[2], ks[3], hidden, hidden)
    w3, b3 = linear(ks[4], ks[5], hidden, output_dim)
    return {"w1": w1, "b1": b1, "w2": w2, "b2": b2, "w3": w3, "b3": b3}


def _reference_bf16(x, params):
    """Plain-JAX reference using the same bf16-in / f32-accumulate recipe."""
    w1b = params["w1"].astype(jnp.bfloat16)
    w2b = params["w2"].astype(jnp.bfloat16)
    w3b = params["w3"].astype(jnp.bfloat16)
    h1 = jnp.dot(x.astype(jnp.bfloat16), w1b,
                 preferred_element_type=jnp.float32) + params["b1"]
    h1 = jnp.maximum(h1, 0.0)
    h2 = jnp.dot(h1.astype(jnp.bfloat16), w2b,
                 preferred_element_type=jnp.float32) + params["b2"]
    h2 = jnp.maximum(h2, 0.0)
    return jnp.dot(h2.astype(jnp.bfloat16), w3b,
                   preferred_element_type=jnp.float32) + params["b3"]


if __name__ == "__main__":
    key = jax.random.PRNGKey(0)
    k_x, k_p = jax.random.split(key)

    batch = 2
    input_dim = 32
    output_dim = 8

    x = jax.random.normal(k_x, (batch, input_dim), dtype=jnp.float32)
    params = init_params(k_p, input_dim, output_dim)

    out = qnetwork_forward(x, params)
    jax.block_until_ready(out)

    assert out.shape == (batch, output_dim)

    # Tight check vs a matched bf16-input / f32-accumulate JAX reference.
    ref_bf16 = _reference_bf16(x, params)
    assert jnp.allclose(out, ref_bf16, atol=1e-3, rtol=1e-3)

    # Loose check vs the pure-f32 forward (bf16 rounding tolerance).
    h1 = jnp.maximum(x @ params["w1"] + params["b1"], 0.0)
    h2 = jnp.maximum(h1 @ params["w2"] + params["b2"], 0.0)
    ref_f32 = h2 @ params["w3"] + params["b3"]
    assert jnp.allclose(out, ref_f32, atol=5e-2, rtol=5e-2)

    print("KERNEL_OK")
</pallas_src>

<mosaic_0001>
module attributes {stable_mosaic.version = 11 : i64} {
  func.func @qnetwork_kernel(%arg0: i32, %arg1: memref<8x32xbf16, #tpu.memory_space<vmem>>, %arg2: memref<32x128xbf16, #tpu.memory_space<vmem>>, %arg3: memref<1x128xf32, #tpu.memory_space<vmem>>, %arg4: memref<128x128xbf16, #tpu.memory_space<vmem>>, %arg5: memref<1x128xf32, #tpu.memory_space<vmem>>, %arg6: memref<128x8xbf16, #tpu.memory_space<vmem>>, %arg7: memref<1x8xf32, #tpu.memory_space<vmem>>, %arg8: memref<8x8xf32, #tpu.memory_space<vmem>>) attributes {dimension_semantics = [#tpu.dimension_semantics<parallel>], iteration_bounds = array<i64: 1>, scalar_prefetch = 0 : i64, scratch_operands = 0 : i64, tpu.core_type = #tpu.core_type<tc>, window_params = [{transform_indices = @transform_0, window_bounds = array<i64: 8, 32>}, {pipeline_mode = #tpu.pipeline_mode<synchronous>, transform_indices = @transform_1, window_bounds = array<i64: 32, 128>}, {pipeline_mode = #tpu.pipeline_mode<synchronous>, transform_indices = @transform_2, window_bounds = array<i64: 1, 128>}, {pipeline_mode = #tpu.pipeline_mode<synchronous>, transform_indices = @transform_3, window_bounds = array<i64: 128, 128>}, {pipeline_mode = #tpu.pipeline_mode<synchronous>, transform_indices = @transform_4, window_bounds = array<i64: 1, 128>}, {pipeline_mode = #tpu.pipeline_mode<synchronous>, transform_indices = @transform_5, window_bounds = array<i64: 128, 8>}, {pipeline_mode = #tpu.pipeline_mode<synchronous>, transform_indices = @transform_6, window_bounds = array<i64: 1, 8>}, {transform_indices = @transform_7, window_bounds = array<i64: 8, 8>}]} {
    %c0 = arith.constant 0 : index
    %c0_0 = arith.constant 0 : index
    %0 = vector.load %arg1[%c0, %c0_0] : memref<8x32xbf16, #tpu.memory_space<vmem>>, vector<8x32xbf16>
    %c0_1 = arith.constant 0 : index
    %c0_2 = arith.constant 0 : index
    %1 = vector.load %arg2[%c0_1, %c0_2] : memref<32x128xbf16, #tpu.memory_space<vmem>>, vector<32x128xbf16>
    %cst = arith.constant dense<0.000000e+00> : vector<8x128xf32>
    %2 = tpu.matmul %0, %1, %cst {dimension_numbers = #tpu.dot_dimension_numbers<[1], [0], [0], [1], [0, 0, 1, 1], [], []>} : vector<8x32xbf16>, vector<32x128xbf16>, vector<8x128xf32> -> vector<8x128xf32>
    %c0_3 = arith.constant 0 : index
    %c0_4 = arith.constant 0 : index
    %3 = vector.load %arg3[%c0_3, %c0_4] : memref<1x128xf32, #tpu.memory_space<vmem>>, vector<1x128xf32>
    %4 = vector.broadcast %3 : vector<1x128xf32> to vector<8x128xf32>
    %5 = arith.addf %2, %4 : vector<8x128xf32>
    %cst_5 = arith.constant 0.000000e+00 : f32
    %6 = vector.broadcast %cst_5 : f32 to vector<8x128xf32>
    %7 = arith.maximumf %5, %6 : vector<8x128xf32>
    %8 = arith.truncf %7 : vector<8x128xf32> to vector<8x128xbf16>
    %c0_6 = arith.constant 0 : index
    %c0_7 = arith.constant 0 : index
    %9 = vector.load %arg4[%c0_6, %c0_7] : memref<128x128xbf16, #tpu.memory_space<vmem>>, vector<128x128xbf16>
    %cst_8 = arith.constant dense<0.000000e+00> : vector<8x128xf32>
    %10 = tpu.matmul %8, %9, %cst_8 {dimension_numbers = #tpu.dot_dimension_numbers<[1], [0], [0], [1], [0, 0, 1, 1], [], []>} : vector<8x128xbf16>, vector<128x128xbf16>, vector<8x128xf32> -> vector<8x128xf32>
    %c0_9 = arith.constant 0 : index
    %c0_10 = arith.constant 0 : index
    %11 = vector.load %arg5[%c0_9, %c0_10] : memref<1x128xf32, #tpu.memory_space<vmem>>, vector<1x128xf32>
    %12 = vector.broadcast %11 : vector<1x128xf32> to vector<8x128xf32>
    %13 = arith.addf %10, %12 : vector<8x128xf32>
    %cst_11 = arith.constant 0.000000e+00 : f32
    %14 = vector.broadcast %cst_11 : f32 to vector<8x128xf32>
    %15 = arith.maximumf %13, %14 : vector<8x128xf32>
    %16 = arith.truncf %15 : vector<8x128xf32> to vector<8x128xbf16>
    %c0_12 = arith.constant 0 : index
    %c0_13 = arith.constant 0 : index
    %17 = vector.load %arg6[%c0_12, %c0_13] : memref<128x8xbf16, #tpu.memory_space<vmem>>, vector<128x8xbf16>
    %cst_14 = arith.constant dense<0.000000e+00> : vector<8x8xf32>
    %18 = tpu.matmul %16, %17, %cst_14 {dimension_numbers = #tpu.dot_dimension_numbers<[1], [0], [0], [1], [0, 0, 1, 1], [], []>} : vector<8x128xbf16>, vector<128x8xbf16>, vector<8x8xf32> -> vector<8x8xf32>
    %c0_15 = arith.constant 0 : index
    %c0_16 = arith.constant 0 : index
    %19 = vector.load %arg7[%c0_15, %c0_16] : memref<1x8xf32, #tpu.memory_space<vmem>>, vector<1x8xf32>
    %20 = vector.broadcast %19 : vector<1x8xf32> to vector<8x8xf32>
    %21 = arith.addf %18, %20 : vector<8x8xf32>
    %c0_17 = arith.constant 0 : index
    %c0_18 = arith.constant 0 : index
    %22 = vector.load %arg8[%c0_17, %c0_18] : memref<8x8xf32, #tpu.memory_space<vmem>>, vector<8x8xf32>
    tpu.vector_store %arg8[%c0_17, %c0_18], %21 {strides = array<i32>} : memref<8x8xf32, #tpu.memory_space<vmem>>, vector<8x8xf32>,
    return
  }
  func.func @transform_0(%arg0: i32) -> (i32, i32) {
    %c0_i32 = arith.constant 0 : i32
    %c0_i32_0 = arith.constant 0 : i32
    return %arg0, %c0_i32 : i32, i32
  }
  func.func @transform_1(%arg0: i32) -> (i32, i32) {
    %c0_i32 = arith.constant 0 : i32
    %c0_i32_0 = arith.constant 0 : i32
    %c0_i32_1 = arith.constant 0 : i32
    return %c0_i32, %c0_i32_0 : i32, i32
  }
  func.func @transform_2(%arg0: i32) -> (i32, i32) {
    %c0_i32 = arith.constant 0 : i32
    %c0_i32_0 = arith.constant 0 : i32
    %c0_i32_1 = arith.constant 0 : i32
    return %c0_i32, %c0_i32_0 : i32, i32
  }
  func.func @transform_3(%arg0: i32) -> (i32, i32) {
    %c0_i32 = arith.constant 0 : i32
    %c0_i32_0 = arith.constant 0 : i32
    %c0_i32_1 = arith.constant 0 : i32
    return %c0_i32, %c0_i32_0 : i32, i32
  }
  func.func @transform_4(%arg0: i32) -> (i32, i32) {
    %c0_i32 = arith.constant 0 : i32
    %c0_i32_0 = arith.constant 0 : i32
    %c0_i32_1 = arith.constant 0 : i32
    return %c0_i32, %c0_i32_0 : i32, i32
  }
  func.func @transform_5(%arg0: i32) -> (i32, i32) {
    %c0_i32 = arith.constant 0 : i32
    %c0_i32_0 = arith.constant 0 : i32
    %c0_i32_1 = arith.constant 0 : i32
    return %c0_i32, %c0_i32_0 : i32, i32
  }
  func.func @transform_6(%arg0: i32) -> (i32, i32) {
    %c0_i32 = arith.constant 0 : i32
    %c0_i32_0 = arith.constant 0 : i32
    %c0_i32_1 = arith.constant 0 : i32
    return %c0_i32, %c0_i32_0 : i32, i32
  }
  func.func @transform_7(%arg0: i32) -> (i32, i32) {
    %c0_i32 = arith.constant 0 : i32
    %c0_i32_0 = arith.constant 0 : i32
    return %arg0, %c0_i32 : i32, i32
  }
}

</mosaic_0001>

<bundles_post_ra>
// kernel: tpu_custom_call.1
= control target key start
LH: loop header
LB: loop body
LE: loop exit
PB: predicated region body
PF: predicated region fallthrough
CT: control target
= control target key end

     0   :  { %12 = vsyncpa [#allocation3], 0  ;;  %s670_s0 = inlined_call_operand.vmem [shape: bf16[8,32], index: 0, kind: input, shape index: {}]   ;;  %s671_s1 = inlined_call_operand.hbm [shape: bf16[32,128], index: 1, kind: input, shape index: {}]   ;;  %s672_s2 = inlined_call_operand.vmem [shape: f32[1,128], index: 2, kind: input, shape index: {}]   ;;  %s673_s3 = inlined_call_operand.vmem [shape: bf16[128,128], index: 3, kind: input, shape index: {}]   ;;  %s674_s4 = inlined_call_operand.vmem [shape: f32[1,128], index: 4, kind: input, shape index: {}]   ;;  %s675_s5 = inlined_call_operand.vmem [shape: bf16[128,8], index: 5, kind: input, shape index: {}]   ;;  %s676_s6 = inlined_call_operand.vmem [shape: f32[1,8], index: 6, kind: input, shape index: {}]   ;;  %s677_s7 = inlined_call_operand.hbm [shape: f32[8,8], index: 7, kind: output, shape index: {}]  }
   0x1   :  { %13 = vsyncpa [#allocation4], 0  ;;  %s516_s24 = smov [#allocation2]   ;;  %s468_s28 = scalar_lea.hbm %s671_s1, 256 }
   0x2   :  { %s21_s25 = sshll.u32 %s516_s24, 4  ;;  %p469_p0 = scmp.ne.s32.totalorder %s671_s1, %s468_s28  ;;  %s22_s25 = int_to_ptr.vmem [resolvable:$true] %s21_s25 }
   0x3   :  { %p472_p1 = scmp.lt.u32.totalorder %s468_s28, %s671_s1 }
   0x5   :  { %p474_p2 = pnand %p472_p1, %p469_p0 }
   0x7   :  { %477 = shalt.err (!%p474_p2)
}
   0x8   :  { %s478_s10 = scalar_lea.vmem %s22_s25, 256  ;;  %p483_p4 = scmp.lt.s32.totalorder %s22_s25, %s22_s25 }
   0x9   :  { %p479_p3 = scmp.ne.s32.totalorder %s22_s25, %s478_s10  ;;  %p484_p5 = scmp.lt.s32.totalorder %s478_s10, %s478_s10 }
   0xb   :  { %p485_p6 = por %p484_p5, %p483_p4 }
   0xd   :  { %p486_p7 = pnand %p485_p6, %p479_p3 }
   0xf   :  { %489 = shalt.err (!%p486_p7)
}
  0x10   :  { %s517_s11 = smov 64   ;;  %s518_s12 = smov 4  }
  0x11   :  { %27 = dma.hbm_to_vmem [thread:$0]  %s671_s1, 256, %s22_s25, [#allocation3], %s517_s11, %s517_s11, %s518_s12  }
  0x12   :  { %512 = dma.done.wait [#allocation3], 256  }
  0x13   :  { %513 = vsyncadd [#allocation3], 4294967040  ;;  %v519_v0 = vmov 0.0   ;;  %vm520_vm0 = vmmov 0   ;;  %v450_v1 = vld [vmem:[#allocation2] sm:$0xff]   ;;  %v451_v2 = vld [vmem:[#allocation2 + $0x8] sm:$0xff]  }
  0x14   :  { %396 = vmatprep.subr.bf16.mxu0 %v519_v0  ;;  %400 = vmatprep.mubr.msk.bf16.mxu0 %vm520_vm0, %v519_v0  ;;  %v452_v3 = vld [vmem:[%s673_s3] sm:$0xff]   ;;  %vm66_vm1 = vcmask 261120   ;;  %v453_v4 = vld [vmem:[%s673_s3 + $0x8] sm:$0xff]   ;;  %v454_v6 = vld [vmem:[%s673_s3 + $0x10] sm:$0xff]   ;;  %s521_s26 = smov [#allocation5]   ;;  %vm336_vm2 = vcmask 64512  }
  0x15   :  { %404 = vmatprep.subr.bf16.mxu1 %v519_v0  ;;  %420 = vmatprep.mubr.msk.bf16.mxu1 %vm520_vm0, %v519_v0  ;;  %v42_v5 = vld [vmem:[%s670_s0] sm:$0xf]  ;;  %v455_v7 = vld [vmem:[%s673_s3 + $0x18] sm:$0xff]   ;;  %v457_v9 = vld [vmem:[%s673_s3 + $0x28] sm:$0xff]   ;;  %s344_s27 = sshll.u32 %s521_s26, 4  ;;  %s345_s27 = int_to_ptr.vmem [resolvable:$true] %s344_s27 }
  0x16   :  { %397 = vmatpush3.bf16.msra.mxu0 %v450_v1  ;;  %405 = vmatpush3.bf16.msra.mxu1 %v452_v3  ;;  %v456_v8 = vld [vmem:[%s673_s3 + $0x20] sm:$0xff]   ;;  %v458_v10 = vld [vmem:[%s673_s3 + $0x30] sm:$0xff]   ;;  %v459_v11 = vld [vmem:[%s673_s3 + $0x38] sm:$0xff]   ;;  %p495_p9 = scmp.lt.s32.totalorder %s345_s27, %s345_s27 }
  0x17   :  { %398 = vmatprep.subr.bf16.mxu0 %v519_v0  ;;  %406 = vmatprep.subr.bf16.mxu1 %v519_v0  ;;  %v460_v12 = vld [vmem:[%s675_s5] sm:$0xff]   ;;  %v461_v13 = vld [vmem:[%s675_s5 + $0x8] sm:$0xff]   ;;  %v462_v14 = vld [vmem:[%s675_s5 + $0x10] sm:$0xff]  }
  0x18   :  { %v463_v15 = vld [vmem:[%s675_s5 + $0x18] sm:$0xff]   ;;  %v464_v16 = vld [vmem:[%s675_s5 + $0x20] sm:$0xff]   ;;  %v465_v17 = vld [vmem:[%s675_s5 + $0x28] sm:$0xff]  }
  0x19   :  { %v353_v18 = vld [vmem:[%s672_s2] ss:$0 sm:$0xff]  ;;  %v466_v26 = vld [vmem:[%s675_s5 + $0x30] sm:$0xff]   ;;  %v467_v27 = vld [vmem:[%s675_s5 + $0x38] sm:$0xff]  }
  0x1a   :  { %399 = vmatpush3.bf16.msra.mxu0 %v451_v2  ;;  %407 = vmatpush3.bf16.msra.mxu1 %v453_v4  ;;  %v357_v28 = vld [vmem:[%s674_s4] ss:$0 sm:$0xff]  ;;  %s490_s4 = scalar_lea.vmem %s345_s27, 128 }
  0x1b   :  { %424 = vmatprep.subr.bf16.mxu0 %v519_v0  ;;  %408 = vmatprep.subr.bf16.mxu1 %v519_v0  ;;  %v366_v36 = vld [vmem:[%s676_s6] ss:$0 sm:$0xff]  ;;  %p491_p8 = scmp.ne.s32.totalorder %s345_s27, %s490_s4  ;;  %p496_p10 = scmp.lt.s32.totalorder %s490_s4, %s490_s4 }
  0x1d   :  { %401 = vmatmul.mubr.msk.bf16.vlgmr.msra.gmra.mrb[0].mxu0 %vm66_vm1, %v42_v5  ;;  %p497_p11 = por %p496_p10, %p495_p9 }
  0x1e   :  { %440 = vmatprep.mubr.msk.bf16.mxu0 %vm520_vm0, %v519_v0  ;;  %409 = vmatpush3.bf16.msra.mxu1 %v454_v6 }
  0x1f   :  { %410 = vmatprep.subr.bf16.mxu1 %v519_v0  ;;  %425 = vmatpush3.bf16.msra.mxu0 %v460_v12  ;;  %p498_p12 = pnand %p497_p11, %p491_p8 }
  0x20   :  { %426 = vmatprep.subr.bf16.mxu0 %v519_v0 }
  0x22   :  { %411 = vmatpush3.bf16.msra.mxu1 %v455_v7 }
  0x23   :  { %412 = vmatprep.subr.bf16.mxu1 %v519_v0  ;;  %427 = vmatpush3.bf16.msra.mxu0 %v461_v13 }
  0x24   :  { %428 = vmatprep.subr.bf16.mxu0 %v519_v0 }
  0x26   :  { %413 = vmatpush3.bf16.msra.mxu1 %v456_v8 }
  0x27   :  { %414 = vmatprep.subr.bf16.mxu1 %v519_v0  ;;  %429 = vmatpush3.bf16.msra.mxu0 %v462_v14 }
  0x28   :  { %430 = vmatprep.subr.bf16.mxu0 %v519_v0 }
  0x2a   :  { %415 = vmatpush3.bf16.msra.mxu1 %v457_v9 }
  0x2b   :  { %416 = vmatprep.subr.bf16.mxu1 %v519_v0  ;;  %431 = vmatpush3.bf16.msra.mxu0 %v463_v15 }
  0x2c   :  { %432 = vmatprep.subr.bf16.mxu0 %v519_v0 }
  0x2e   :  { %417 = vmatpush3.bf16.msra.mxu1 %v458_v10 }
  0x2f   :  { %418 = vmatprep.subr.bf16.mxu1 %v519_v0  ;;  %433 = vmatpush3.bf16.msra.mxu0 %v464_v16 }
  0x30   :  { %434 = vmatprep.subr.bf16.mxu0 %v519_v0 }
  0x32   :  { %419 = vmatpush3.bf16.msra.mxu1 %v459_v11 }
  0x33   :  { %435 = vmatpush3.bf16.msra.mxu0 %v465_v17 }
  0x34   :  { %436 = vmatprep.subr.bf16.mxu0 %v519_v0 }
  0x37   :  { %437 = vmatpush3.bf16.msra.mxu0 %v466_v26 }
  0x38   :  { %438 = vmatprep.subr.bf16.mxu0 %v519_v0 }
  0x3b   :  { %439 = vmatpush3.bf16.msra.mxu0 %v467_v27 }
  0xf0   :  { %v104_v19 = vpop.f32.mrb[0].mxu0 }
  0xf1   :  { %v105_v20 = vadd.f32 %v353_v18, %v104_v19  ;;  %v402_v21 = vpop.f32.mrb[1].mxu0 }
  0xf2   :  { %v107_v22 = vpop.f32.mrb[2].mxu0 }
  0xf3   :  { %v110_v23 = vmax.f32 %v105_v20, 0.0  ;;  %v403_v24 = vpop.f32.mrb[3].mxu0 }
  0xf5   :  { %v111_v25 = vpack.c.bf16 %v110_v23, %v110_v23 }
  0xf7   :  { %421 = vmatmul.mubr.bf16.vlgmr.msra.gmra.mrb[0].mxu1 %v111_v25 }
 0x1ca   :  { %v217_v29 = vpop.f32.mrb[0].mxu1 }
 0x1cb   :  { %v218_v30 = vadd.f32 %v357_v28, %v217_v29  ;;  %v422_v31 = vpop.f32.mrb[1].mxu1 }
 0x1cc   :  { %v220_v32 = vpop.f32.mrb[2].mxu1 }
 0x1cd   :  { %v223_v33 = vmax.f32 %v218_v30, 0.0  ;;  %v423_v34 = vpop.f32.mrb[3].mxu1 }
 0x1cf   :  { %v224_v35 = vpack.c.bf16 %v223_v33, %v223_v33 }
 0x1d1   :  { %441 = vmatmul.mubr.bf16.vlgmr.msra.gmra.mrb[4].mxu0 %v224_v35 }
 0x2a4   :  { %v330_v37 = vpop.f32.mrb[4].mxu0 }
 0x2a5   :  { %v331_v38 = vadd.f32 %v366_v36, %v330_v37  ;;  %v442_v39 = vpop.f32.mrb[5].mxu0 }
 0x2a6   :  { %v333_v40 = vpop.f32.mrb[6].mxu0 }
 0x2a7   :  { %v443_v41 = vpop.f32.mrb[7].mxu0  ;;  %337 = vst.msk [vmem:[#allocation5] sm:$0xff] %vm336_vm2, %v331_v38 }
 0x2a8   :  { %501 = shalt.err (!%p498_p12)
}
 0x2a9   :  { %s502_s6 = scalar_lea.hbm %s677_s7, 128 }
 0x2aa   :  { %p503_p13 = scmp.ne.s32.totalorder %s677_s7, %s502_s6  ;;  %p506_p0 = scmp.lt.u32.totalorder %s502_s6, %s677_s7 }
 0x2ac   :  { %p508_p1 = pnand %p506_p0, %p503_p13 }
 0x2ae   :  { %511 = shalt.err (!%p508_p1)
}
 0x2af   :  { %347 = dma.vmem_to_hbm [thread:$0]  %s345_s27, 128, %s677_s7, [#allocation4]  }
 0x2b0   :  { %514 = dma.done.wait [#allocation4], 128  }
 0x2b1   :  { %515 = vsyncadd [#allocation4], 4294967168 }
 0x2b2   :  { %351 = vsyncpa [#allocation3], 1 }
 0x2b3   :  { %352 = vsyncpa [#allocation4], 1 }

</bundles_post_ra>
